<compile_context>
chip_gen: v6e
topology: v6e:2x2x1
jax: 0.10.0
libtpu: 0.0.40
codegen_flags: <defaults>
</compile_context>

<pallas_src>
import math

import jax
import jax.numpy as jnp
import numpy as np
from jax.experimental import pallas as pl
from jax.experimental.pallas import tpu as pltpu

_LANE = 128
_TARGET_TILE_BYTES = 4 * 1024 * 1024   # ~4 MiB per buffer (85%+ of HBM roofline)
_VMEM_CAP_BYTES = 30 * 1024 * 1024     # keep 6 tiles + gain under v7x's 64 MiB/TC


def _gamma_division_kernel(c_ref, g_ref, o_ref):
    # Pure streaming elementwise multiply; g is either a (1, W) row
    # (broadcast over sublanes) or a full (block_rows, W) pre-broadcast tile.
    o_ref[...] = c_ref[...] * g_ref[...]


def make_gamma_vector(cep_order: int, gamma: float, dtype=jnp.float32):
    """Deterministic parameter init, matching the PyTorch buffer `g`."""
    g = np.full(cep_order + 1, 1.0 / gamma, dtype=np.float64)
    g[0] = 1.0
    return jnp.asarray(g, dtype=dtype)


def _sublane_multiple(dtype) -> int:
    itemsize = jnp.dtype(dtype).itemsize
    return {4: 8, 2: 16, 1: 32}.get(itemsize, 8)


def _pick_block_rows(R: int, W: int, itemsize: int, unit: int, override=None) -> int:
    """Row-tile size: multiple of `unit`, ~4 MiB, VMEM-safe, and grid>=2 when possible."""
    if R <= unit:
        return R                                   # single full-dim block (always legal)
    bytes_per_row = W * itemsize
    if override is not None:
        br = -(-int(override) // unit) * unit      # round up to unit
        return min(max(unit, br), R)
    t = (_TARGET_TILE_BYTES // bytes_per_row) // unit * unit
    vmem_rows = ((_VMEM_CAP_BYTES // 7) // bytes_per_row) // unit * unit
    t = min(t, vmem_rows)
    # Cap so grid_n >= 2: both TensorCores on v7x get work.
    half = -(-R // 2)
    half = -(-half // unit) * unit
    t = min(t, half)
    return max(unit, t)


def gamma_division(c: jax.Array, g: jax.Array, *, block_rows: int | None = None) -> jax.Array:
    """Apply GammaDivision: c * g, g broadcast over leading dims.  c: (..., D); g: (D,)."""
    orig_shape = c.shape
    D = int(orig_shape[-1])
    assert g.shape == (D,), f"g must have shape ({D},), got {g.shape}"
    dtype = c.dtype
    itemsize = jnp.dtype(dtype).itemsize
    sub_mult = _sublane_multiple(dtype)
    g = g.astype(dtype)

    N = int(np.prod(orig_shape))
    B = N // D

    # ---- Layout selection (no copies: all reshapes below are row-major views).
    lane_dense = (D % _LANE != 0) and (N % _LANE == 0)
    if lane_dense:
        # Flatten to (R, 128): unmasked full-lane stores.  The gain pattern is
        # periodic with period P rows; block starts stay aligned to it.
        W = _LANE
        R = N // _LANE
        P = math.lcm(D, _LANE) // _LANE
        unit = math.lcm(P, sub_mult)
    else:
        # D already a multiple of 128 (lane-dense as-is), or total size not a
        # multiple of 128: keep rows.  Only in the latter case do stores on the
        # trailing partial lane-vreg pay masking.
        W = D
        R = B
        P = 1
        unit = sub_mult
    cw = c.reshape(R, W)

    br = _pick_block_rows(R, W, itemsize, unit, override=block_rows)
    grid_n = -(-R // br)  # cdiv; ragged last block is masked by Pallas

    # ---- Gain operand.
    if lane_dense and P > 1:
        # Pre-broadcast to a full (block_rows, 128) tile: block starts are
        # multiples of block_rows*128 which is a multiple of D, so one tile is
        # valid for every block.  Constant block index -> resident in VMEM.
        reps = br * W // D
        gw = jnp.tile(g, reps).reshape(br, W)
    elif lane_dense:
        gw = jnp.tile(g, W // D).reshape(1, W)     # one 128-lane gain row
    else:
        gw = g.reshape(1, W)

    tile_bytes = br * W * itemsize
    g_bytes = gw.size * itemsize
    vmem_limit = int(min(32 * 2**20,
                         max(8 * 2**20, 6 * tile_bytes + 2 * g_bytes + 2**20)))

    out = pl.pallas_call(
        _gamma_division_kernel,
        out_shape=jax.ShapeDtypeStruct((R, W), dtype),
        grid=(grid_n,),
        in_specs=[
            pl.BlockSpec((br, W), lambda i: (i, 0)),           # c tile (streamed)
            pl.BlockSpec(gw.shape, lambda i: (0, 0)),          # gain (resident)
        ],
        out_specs=pl.BlockSpec((br, W), lambda i: (i, 0)),
        compiler_params=pltpu.CompilerParams(
            dimension_semantics=("parallel",),                 # megacore sharding
            vmem_limit_bytes=vmem_limit,
        ),
        cost_estimate=pl.CostEstimate(
            flops=R * W,
            transcendentals=0,
            bytes_accessed=(2 * R * W + gw.size) * itemsize,
        ),
    )(cw, gw)

    return out.reshape(orig_shape)


if __name__ == "__main__":
    key = jax.random.PRNGKey(0)

    # Case 1 (module-typical): cep_order=31 -> D=32, batch=2 x 50 frames.
    cep_order, gamma = 31, -0.5
    c1 = jax.random.normal(key, (2, 50, cep_order + 1), dtype=jnp.float32)
    g1 = make_gamma_vector(cep_order, gamma)
    o1 = jax.block_until_ready(gamma_division(c1, g1))
    np.testing.assert_allclose(np.asarray(o1), np.asarray(c1 * g1), rtol=1e-6, atol=1e-6)

    # Case 2: D=25 (does not divide 128) with total a multiple of 128
    # -> lane-dense flat path with sublane-periodic gain tile.
    c2 = jax.random.normal(jax.random.fold_in(key, 1), (4, 32, 25), dtype=jnp.float32)
    g2 = make_gamma_vector(24, 0.75)
    o2 = jax.block_until_ready(gamma_division(c2, g2))
    np.testing.assert_allclose(np.asarray(o2), np.asarray(c2 * g2), rtol=1e-6, atol=1e-6)

    # Case 3: D=25 with total NOT a multiple of 128 -> row-layout fallback.
    c3 = jax.random.normal(jax.random.fold_in(key, 2), (3, 7, 25), dtype=jnp.float32)
    o3 = jax.block_until_ready(gamma_division(c3, g2))
    np.testing.assert_allclose(np.asarray(o3), np.asarray(c3 * g2), rtol=1e-6, atol=1e-6)

    print("KERNEL_OK")
</pallas_src>

<mosaic_0001>
module attributes {stable_mosaic.version = 11 : i64} {
  func.func @_gamma_division_kernel(%arg0: i32, %arg1: memref<16x128xf32, #tpu.memory_space<vmem>>, %arg2: memref<1x128xf32, #tpu.memory_space<vmem>>, %arg3: memref<16x128xf32, #tpu.memory_space<vmem>>) attributes {dimension_semantics = [#tpu.dimension_semantics<parallel>], iteration_bounds = array<i64: 2>, scalar_prefetch = 0 : i64, scratch_operands = 0 : i64, tpu.core_type = #tpu.core_type<tc>, window_params = [{transform_indices = @transform_0, window_bounds = array<i64: 16, 128>}, {pipeline_mode = #tpu.pipeline_mode<synchronous>, transform_indices = @transform_1, window_bounds = array<i64: 1, 128>}, {transform_indices = @transform_2, window_bounds = array<i64: 16, 128>}]} {
    %c0 = arith.constant 0 : index
    %c0_0 = arith.constant 0 : index
    %0 = vector.load %arg1[%c0, %c0_0] : memref<16x128xf32, #tpu.memory_space<vmem>>, vector<16x128xf32>
    %c0_1 = arith.constant 0 : index
    %c0_2 = arith.constant 0 : index
    %1 = vector.load %arg2[%c0_1, %c0_2] : memref<1x128xf32, #tpu.memory_space<vmem>>, vector<1x128xf32>
    %2 = vector.broadcast %1 : vector<1x128xf32> to vector<16x128xf32>
    %3 = arith.mulf %0, %2 : vector<16x128xf32>
    %c0_3 = arith.constant 0 : index
    %c0_4 = arith.constant 0 : index
    %4 = vector.load %arg3[%c0_3, %c0_4] : memref<16x128xf32, #tpu.memory_space<vmem>>, vector<16x128xf32>
    tpu.vector_store %arg3[%c0_3, %c0_4], %3 {strides = array<i32>} : memref<16x128xf32, #tpu.memory_space<vmem>>, vector<16x128xf32>,
    return
  }
  func.func @transform_0(%arg0: i32) -> (i32, i32) {
    %c0_i32 = arith.constant 0 : i32
    %c0_i32_0 = arith.constant 0 : i32
    return %arg0, %c0_i32 : i32, i32
  }
  func.func @transform_1(%arg0: i32) -> (i32, i32) {
    %c0_i32 = arith.constant 0 : i32
    %c0_i32_0 = arith.constant 0 : i32
    %c0_i32_1 = arith.constant 0 : i32
    return %c0_i32, %c0_i32_0 : i32, i32
  }
  func.func @transform_2(%arg0: i32) -> (i32, i32) {
    %c0_i32 = arith.constant 0 : i32
    %c0_i32_0 = arith.constant 0 : i32
    return %arg0, %c0_i32 : i32, i32
  }
}

</mosaic_0001>

<bundles_post_ra>
// kernel: tpu_custom_call.1
= control target key start
LH: loop header
LB: loop body
LE: loop exit
PB: predicated region body
PF: predicated region fallthrough
CT: control target
= control target key end

     0   :  { %7 = vsyncpa [#allocation3], 0  ;;  %s603_s0 = inlined_call_operand.hbm [shape: f32[25,128], index: 0, kind: input, shape index: {}]   ;;  %s604_s1 = inlined_call_operand.vmem [shape: f32[1,128], index: 1, kind: input, shape index: {}]   ;;  %s605_s2 = inlined_call_operand.hbm [shape: f32[25,128], index: 2, kind: output, shape index: {}]  }
   0x1   :  { %9 = vsyncpa [#allocation3 + $0x1], 0 }
   0x2   :  { %10 = vsyncpa [#allocation4], 0 }
   0x3   :  { %12 = vsyncpa [#allocation4 + $0x1], 0  ;;  %s446_s9 = smov 0   ;;  %s448_s10 = smov 0  }
   0x4   :  { %s450_s11 = smov 0   ;;  %s452_s12 = smov 0  }
   0x5 LB: > { %s467_s13 = sadd.s32 4294967295, %s423_s12   ;;  %s264_s14 = sadd.s32 4294967294, %s423_s12   ;;  %s423_s12 = sphi %s452_s12, %s620_s12   ;;  %s419_s11 = sphi %s450_s11, %s619_s11   ;;  %s415_s10 = sphi %s448_s10, %s618_s10   ;;  %s411_s9 = sphi %s446_s9, %s617_s9  }
   0x6   : > { %s471_s15 = sadd.s32 1, %s423_s12   ;;  %s25_s16 = sadd.s32 1, %s419_s11 }
   0x7   : > { %s22_s17 = ssub.s32 %s423_s12, %s471_s15  ;;  %p32_p0 = scmp.ne.s32.totalorder %s419_s11, %s415_s10 }
   0x8   : > { %p23_p1 = scmp.eq.s32.totalorder %s22_s17, 0  ;;  %p33_p2 = scmp.eq.s32.totalorder %s423_s12, 0 }
   0x9   : > { %p38_p3 = scmp.ne.s32.totalorder %s415_s10, %s411_s9  ;;  %p39_p4 = scmp.eq.s32.totalorder %s467_s13, 0 }
   0xa   : > { %s483_s18 = scalar_select %p23_p1, %s419_s11, %s25_s16  }
   0xb   : > { %p485_p5 = por %p33_p2, %p32_p0  ;;  %p489_p6 = por %p39_p4, %p38_p3 }
   0xc   : > { %p83_p7 = scmp.eq.s32.totalorder %s467_s13, 1  ;;  %p89_p8 = scmp.eq.s32.totalorder %s264_s14, 1 }
   0xd   : > { %s609_s20 = scalar_select %p489_p6, 1, 0 }
   0xe   : > { %p293_p10 = scmp.lt.s32.totalorder %s423_s12, 2  ;;  %p496_p11 = por %p83_p7, %p32_p0 }
   0xf   : > { %p500_p12 = por %p89_p8, %p38_p3  ;;  %s112_s23 = sand.u32 1, %s419_s11  }
  0x10   : > { %s610_s21 = scalar_select %p496_p11, 1, 0 }
  0x11   : > { %s611_s22 = scalar_select %p500_p12, 1, 0 }
  0x12   : > { %s279_s24 = sshll.u32 %s423_s12, 8  ;;  %s267_s25 = sshll.u32 %s112_s23, 4 }
  0x13   : > { %s509_s28 = scalar_lea.hbm %s603_s0, %s279_s24  ;;  %s116_s29 = scalar_lea.vmem [#allocation2], %s267_s25 }
  0x14   : > { %s123_s30 = sshll.u32 %s116_s29, 4  ;;  %p513_p13 = pnand %p293_p10, %p485_p5  ;;  %s517_s30 = int_to_ptr.vmem [resolvable:$true] %s123_s30 }
  0x15   : > { %s519_s4 = scalar_lea.sflag [#allocation3], %s112_s23  ;;  %s331_s5 = scalar_lea.hbm %s509_s28, 256 }
  0x16   : > { %p332_p0 = scmp.ne.s32.totalorder %s509_s28, %s331_s5  ;;  %p333_p1 = pneg %p513_p13 }
  0x17   : > { %s336_s8 = scalar_lea.hbm %s603_s0, 512  ;;  %p337_p4 = scmp.lt.s32.totalorder %s509_s28, %s603_s0 }
  0x18   : > { %p334_p2 = pnand %p333_p1, %p332_p0  ;;  %p338_p5 = scmp.lt.s32.totalorder %s336_s8, %s331_s5 }
  0x1a   : > { %p335_p3 = pneg %p334_p2  ;;  %p339_p7 = por %p338_p5, %p337_p4 }
  0x1c   : > { %p340_p8 = pnand %p339_p7, %p335_p3 }
  0x1e   : > { %343 = shalt.err (!%p340_p8)
}
  0x1f   : > { %s344_s17 = scalar_lea.vmem %s517_s30, 256  ;;  %s425_s19 = smov [#allocation2]  }
  0x20   : > { %p345_p10 = scmp.ne.s32.totalorder %s517_s30, %s344_s17  ;;  %s349_s23 = sshll.u32 %s425_s19, 4  ;;  %s350_s23 = int_to_ptr.vmem [resolvable:$false] %s349_s23 }
  0x21   : > { %s351_s24 = scalar_lea.vmem %s350_s23, 512  ;;  %p352_p2 = scmp.lt.s32.totalorder %s517_s30, %s350_s23 }
  0x22   : > { %p347_p9 = pnand %p345_p10, %p333_p1  ;;  %p353_p12 = scmp.lt.s32.totalorder %s351_s24, %s344_s17 }
  0x24   : > { %p348_p0 = pneg %p347_p9  ;;  %p354_p11 = por %p353_p12, %p352_p2 }
  0x26   : > { %p355_p6 = pnand %p354_p11, %p348_p0 }
  0x28   : > { %358 = shalt.err (!%p355_p6)
}
  0x29   : > { %s426_s25 = smov 128   ;;  %s427_s26 = smov 8  }
  0x2a   : > { %288 = dma.hbm_to_vmem [thread:$0]  (!%p513_p13), %s509_s28, 256, %s517_s30, %s519_s4, %s426_s25, %s426_s25, %s427_s26  }
  0x2b   : > { %p270_p9 = scmp.ge.s32.totalorder %s423_s12, 1  ;;  %p131_p1 = scmp.lt.s32.totalorder %s423_s12, 3 }
  0x2d   : > { %p132_p3 = pnand %p270_p9, %p131_p1 }
  0x2e   : > { %s543_s27 = sand.u32 (!%p132_p3), 1, %s415_s10   ;;  %p613_p6 = scmp.ne.s32.totalorder (!%p132_p3), %s609_s20, 0 }
  0x2f   : > { %135 = sbr.rel (%p132_p3) target bundleno = 79 (0x4f), region = 28  ;;  %s271_s29 = sshll.u32 (!%p132_p3), %s543_s27, 4 }
  0x30   : > { %s138_s5 = scalar_lea.sflag (!%p132_p3), [#allocation3], %s543_s27  ;;  %s141_s6 = scalar_lea.vmem (!%p132_p3), [#allocation2], %s271_s29 }
  0x34   : > { %402 = dma.done.wait (%p613_p6), %s138_s5, 256  }
  0x35   : > { %404 = vsyncadd (%p613_p6), %s138_s5, 4294967040  ;;  %s161_s28 = scalar_lea.vmem [#allocation5], %s271_s29  ;;  %s280_s3 = sshll.u32 %s467_s13, 8  ;;  %v164_v0 = vld [vmem:[%s141_s6] sm:$0xff]  ;;  %v165_v2 = vld [vmem:[%s141_s6 + $0x8] sm:$0xff] }
  0x36   : > { %s191_s30 = sshll.u32 %s161_s28, 4  ;;  %v273_v1 = vld [vmem:[%s604_s1] ss:$0 sm:$0xff]  ;;  %s560_s14 = scalar_lea.hbm %s605_s2, %s280_s3  ;;  %s555_s30 = int_to_ptr.vmem [resolvable:$true] %s191_s30 }
  0x37   : > { %v173_v3 = vmul.f32 %v273_v1, %v164_v0  ;;  %v174_v4 = vmul.f32 %v273_v1, %v165_v2  ;;  %s178_s13 = scalar_lea.sflag [#allocation4], %s543_s27  ;;  %s359_s16 = scalar_lea.vmem %s555_s30, 256 }
  0x38   : > { %p360_p11 = scmp.ne.s32.totalorder %s555_s30, %s359_s16  ;;  %p614_p12 = scmp.ne.s32.totalorder %s610_s21, 0 }
  0x39   : > { %175 = vst [vmem:[%s161_s28] sm:$0xff] %v173_v3  ;;  %176 = vst [vmem:[%s161_s28 + $0x8] sm:$0xff] %v174_v4  ;;  %s428_s17 = smov [#allocation5]  }
  0x3a   : > { %p361_p13 = pnand %p360_p11, %p614_p12  ;;  %s363_s19 = sshll.u32 %s428_s17, 4  ;;  %s364_s19 = int_to_ptr.vmem [resolvable:$false] %s363_s19 }
  0x3b   : > { %s365_s23 = scalar_lea.vmem %s364_s19, 512  ;;  %p366_p5 = scmp.lt.s32.totalorder %s555_s30, %s364_s19 }
  0x3c   : > { %p362_p4 = pneg %p361_p13  ;;  %p367_p7 = scmp.lt.s32.totalorder %s365_s23, %s359_s16 }
  0x3e   : > { %p368_p8 = por %p367_p7, %p366_p5 }
  0x40   : > { %p369_p10 = pnand %p368_p8, %p362_p4 }
  0x42   : > { %372 = shalt.err (!%p369_p10)
}
  0x43   : > { %s373_s24 = scalar_lea.hbm %s560_s14, 256  ;;  %s377_s29 = scalar_lea.hbm %s605_s2, 512 }
  0x44   : > { %p374_p0 = scmp.ne.s32.totalorder %s560_s14, %s373_s24  ;;  %p378_p1 = scmp.lt.s32.totalorder %s560_s14, %s605_s2 }
  0x45   : > { %p379_p3 = scmp.lt.s32.totalorder %s377_s29, %s373_s24 }
  0x46   : > { %p375_p2 = pnand %p374_p0, %p614_p12 }
  0x47   : > { %p380_p6 = por %p379_p3, %p378_p1 }
  0x48   : > { %p376_p9 = pneg %p375_p2 }
  0x4a   : > { %p381_p11 = pnand %p380_p6, %p376_p9 }
  0x4c   : > { %384 = shalt.err (!%p381_p11)
}
  0x4d   : > { %s429_s28 = smov 128   ;;  %s430_s3 = smov 8  }
  0x4e   : > { %283 = dma.vmem_to_hbm [thread:$0]  (%p614_p12), %s555_s30, 256, %s560_s14, %s178_s13, %s429_s28, %s429_s28, %s430_s3  }
  0x4f PF: > { %s206_s4 = sand.u32 1, %s411_s9   ;;  %p615_p13 = scmp.ne.s32.totalorder %s611_s22, 0 }
  0x50   : > { %p616_p4 = scmp.ge.s32.totalorder %s423_s12, 2  ;;  %s207_s7 = scalar_lea.sflag [#allocation4], %s206_s4 }
  0x52   : > { %p290_p5 = pnand %p616_p4, %p615_p13 }
  0x54   : > { %p291_p7 = pneg %p290_p5 }
  0x56   : > { %406 = dma.done.wait (%p291_p7), %s207_s7, 256  }
  0x57   : > { %408 = vsyncadd (%p291_p7), %s207_s7, 4294967040  ;;  %p15_p8 = scmp.ge.s32.totalorder %s471_s15, 4   ;;  %s617_s9 = smov %s415_s10 }
  0x58   : > { %s618_s10 = smov %s419_s11  ;;  %s619_s11 = smov %s483_s18 }
  0x59   : > { %s620_s12 = smov %s471_s15  ;;  %17 = sbr.rel (!%p15_p8) target bundleno = 5 (0x5), region = 73 }
  0x5e   :  { %212 = vsyncpa [#allocation3], 1 }
  0x5f   :  { %214 = vsyncpa [#allocation3 + $0x1], 1 }
  0x60   :  { %215 = vsyncpa [#allocation4], 1 }
  0x61   :  { %217 = vsyncpa [#allocation4 + $0x1], 1 }

</bundles_post_ra>
